<compile_context>
chip_gen: v5e
topology: v5e:2x2
jax: 0.10.0
libtpu: 0.0.40
codegen_flags: <defaults>
</compile_context>

<pallas_src>
import functools
import math

import jax
import jax.numpy as jnp
from jax.experimental import pallas as pl
from jax.experimental.pallas import tpu as pltpu

# ----------------------------- module "parameters" ---------------------------
N_FFT = 64
HOP_LENGTH = 16
WIN_LENGTH = 64
APPLY_LINEAR_LOG = True
MEAN = 15.0
INVSTDDEV = 0.25

_INT16_MAX = 32767
_DECIBEL = 2 * 20 * math.log10(_INT16_MAX)
_GAIN = 10.0 ** (0.05 * _DECIBEL)            # == 32767 ** 2
_E = math.e
_EPS = 1e-6

N_FREQ = N_FFT // 2 + 1                      # onesided bins (33)
_HALF = ((N_FREQ + 7) // 8) * 8              # sublane-padded re/im half (40)
_BLOCKS_PER_FRAME = N_FFT // HOP_LENGTH      # 4 hop-blocks per frame

assert N_FFT % HOP_LENGTH == 0
assert HOP_LENGTH % 8 == 0                   # hop blocks live on the sublane axis


def _round_up(x, m):
    return ((x + m - 1) // m) * m


def _hann_window(win_length):
    # torch.hann_window default: periodic=True
    n = jnp.arange(win_length, dtype=jnp.float32)
    return 0.5 * (1.0 - jnp.cos(2.0 * jnp.pi * n / win_length))


def _windowed_dft_weights():
    """(2*_HALF, N_FFT) = [win*cos ; pad ; win*sin ; pad], transposed DFT."""
    win = _hann_window(WIN_LENGTH)
    pad_left = (N_FFT - WIN_LENGTH) // 2      # torch.stft centers short windows
    win_full = jnp.zeros((N_FFT,), jnp.float32).at[
        pad_left:pad_left + WIN_LENGTH].set(win)
    n = jnp.arange(N_FFT, dtype=jnp.float32)[None, :]
    k = jnp.arange(N_FREQ, dtype=jnp.float32)[:, None]
    ang = 2.0 * jnp.pi * k * n / N_FFT                       # (N_FREQ, N_FFT)
    cos_t = jnp.cos(ang) * win_full[None, :]
    sin_t = jnp.sin(ang) * win_full[None, :]
    w = jnp.zeros((2 * _HALF, N_FFT), jnp.float32)
    w = w.at[:N_FREQ].set(cos_t)
    w = w.at[_HALF:_HALF + N_FREQ].set(sin_t)
    return w


# ---------------------------------- kernel -----------------------------------
def _spectrogram_kernel(blocks_ref, tail_ref, w_ref, out_ref):
    # blocks_ref: (1, HOP, F)   hop-phase-major waveform blocks for this tile
    # tail_ref:   (1, HOP, 128) next 128 hop-blocks (frame-overlap spillover)
    # w_ref:      (2*_HALF, N_FFT) windowed [cos ; sin] DFT weights
    # out_ref:    (1, N_FREQ, F)   spectrogram tile, frames on the lane axis
    main = blocks_ref[0]                                     # (HOP, F)
    tail = tail_ref[0]                                       # (HOP, 128)
    F = main.shape[1]
    L = F + tail.shape[1]
    full = jnp.concatenate([main, tail], axis=1)             # (HOP, F+128)

    # Build the transposed frame matrix (N_FFT, F) entirely in VMEM:
    #   frames_t[HOP*j + m, f] = waveform[f*HOP + HOP*j + m]
    # i.e. hop-block j of every frame = `full` shifted left by j columns.
    parts = []
    for j in range(_BLOCKS_PER_FRAME):
        shifted = full if j == 0 else pltpu.roll(full, shift=L - j, axis=1)
        parts.append(shifted[:, :F])
    frames_t = jnp.concatenate(parts, axis=0)                # (N_FFT, F)

    res = jnp.dot(w_ref[...], frames_t,
                  preferred_element_type=jnp.float32)        # (2*_HALF, F)
    re = res[:_HALF]
    im = res[_HALF:]
    power = re * re + im * im                                # |X|^2, (_HALF, F)

    if APPLY_LINEAR_LOG and _EPS * _GAIN > _E:
        # (power+eps)*gain >= eps*gain ~ 1073.7 > e -> log branch always taken.
        scale = INVSTDDEV
        bias = INVSTDDEV * (math.log(_GAIN) - MEAN)
        out = scale * jnp.log(power + _EPS) + bias
    elif APPLY_LINEAR_LOG:
        x = (power + _EPS) * _GAIN
        x = jnp.where(x > _E, jnp.log(x), x)
        x = jnp.where(x <= _E, x / _E, x)
        out = (x - MEAN) * INVSTDDEV
    else:
        out = (jnp.log(power + _EPS) - MEAN) * INVSTDDEV

    out_ref[0] = out[:N_FREQ]


# --------------------------------- wrapper ------------------------------------
@functools.partial(jax.jit, static_argnames=("frame_tile",))
def tfjs_old_piecewise_spectrogram(waveform, frame_tile=2048):
    """waveform: (B, T) float32 -> (B, N_FREQ, n_frames) float32 (torch.stft layout)."""
    waveform = waveform.astype(jnp.float32)
    B, T = waveform.shape
    if T < N_FFT:
        raise ValueError("waveform shorter than n_fft")
    n_frames = 1 + (T - N_FFT) // HOP_LENGTH

    # Frame tile = lane axis of the output; multiple of 128 for dense stores
    # and so the tail block lands on a 128-column boundary.
    tile = min(_round_up(frame_tile, 128), _round_up(n_frames, 128))
    num_tiles = pl.cdiv(n_frames, tile)

    # Hop-phase-major view: blocks_t[b, m, c] = wav[b, c*HOP + m].
    # Padded so every (main, tail) block read is in bounds.
    n_cols = num_tiles * tile + 128
    t_pad = n_cols * HOP_LENGTH
    wav = jnp.pad(waveform, ((0, 0), (0, t_pad - T)))
    blocks_t = jnp.transpose(wav.reshape(B, n_cols, HOP_LENGTH), (0, 2, 1))

    w = _windowed_dft_weights()

    # Exact output width when n_frames >= tile (uneven last tile masked by
    # Pallas); pad + slice only in the tiny n_frames < tile case.
    out_cols = n_frames if n_frames >= tile else tile

    out = pl.pallas_call(
        _spectrogram_kernel,
        out_shape=jax.ShapeDtypeStruct((B, N_FREQ, out_cols), jnp.float32),
        grid_spec=pltpu.PrefetchScalarGridSpec(
            num_scalar_prefetch=0,
            grid=(B, num_tiles),
            in_specs=[
                pl.BlockSpec((1, HOP_LENGTH, tile), lambda b, i: (b, 0, i)),
                pl.BlockSpec((1, HOP_LENGTH, 128),
                             lambda b, i: (b, 0, (i + 1) * (tile // 128))),
                pl.BlockSpec((2 * _HALF, N_FFT), lambda b, i: (0, 0)),
            ],
            out_specs=pl.BlockSpec((1, N_FREQ, tile), lambda b, i: (b, 0, i)),
        ),
        compiler_params=pltpu.CompilerParams(
            dimension_semantics=("parallel", "parallel"),
            vmem_limit_bytes=32 * 1024 * 1024,
        ),
    )(blocks_t, blocks_t, w)

    if out_cols != n_frames:
        out = out[:, :, :n_frames]
    return out


# -------------------------------- reference -----------------------------------
def _reference(waveform):
    waveform = waveform.astype(jnp.float32)
    B, T = waveform.shape
    n_frames = 1 + (T - N_FFT) // HOP_LENGTH
    starts = jnp.arange(n_frames) * HOP_LENGTH
    idx = starts[:, None] + jnp.arange(N_FFT)[None, :]
    frames = waveform[:, idx]                                # (B, n_frames, n_fft)
    win = _hann_window(WIN_LENGTH)
    pad_left = (N_FFT - WIN_LENGTH) // 2
    win_full = jnp.zeros((N_FFT,), jnp.float32).at[
        pad_left:pad_left + WIN_LENGTH].set(win)
    fw = frames * win_full[None, None, :]
    spec = jnp.fft.rfft(fw, n=N_FFT, axis=-1)
    power = jnp.abs(spec) ** 2
    if APPLY_LINEAR_LOG:
        x = (power + _EPS) * _GAIN
        x = jnp.where(x > _E, jnp.log(x), x)
        x = jnp.where(x <= _E, x / _E, x)
    else:
        x = jnp.log(power + _EPS)
    x = (x - MEAN) * INVSTDDEV
    return jnp.transpose(x, (0, 2, 1))                       # (B, n_freq, n_frames)


if __name__ == "__main__":
    key = jax.random.PRNGKey(0)

    def _check(B, T, frame_tile):
        wav = jax.random.uniform(jax.random.fold_in(key, T), (B, T),
                                 jnp.float32, -1.0, 1.0)
        out = jax.block_until_ready(
            tfjs_old_piecewise_spectrogram(wav, frame_tile=frame_tile))
        n_frames = 1 + (T - N_FFT) // HOP_LENGTH
        assert out.shape == (B, N_FREQ, n_frames), out.shape
        ref = _reference(wav)
        err = float(jnp.max(jnp.abs(out - ref)))
        assert err < 1e-3, err

    _check(B=2, T=4144, frame_tile=2048)   # 256 frames, one tile per batch elem
    _check(B=2, T=4144, frame_tile=128)    # 256 frames, 2 tiles: cross-tile overlap
    _check(B=2, T=304,  frame_tile=2048)   # 16 frames: padded-output small path

    print("KERNEL_OK")
</pallas_src>

<mosaic_0001>
module attributes {stable_mosaic.version = 11 : i64} {
  func.func @_spectrogram_kernel(%arg0: i32, %arg1: i32, %arg2: memref<1x16x256xf32, #tpu.memory_space<vmem>>, %arg3: memref<1x16x128xf32, #tpu.memory_space<vmem>>, %arg4: memref<80x64xf32, #tpu.memory_space<vmem>>, %arg5: memref<1x33x256xf32, #tpu.memory_space<vmem>>) attributes {dimension_semantics = [#tpu.dimension_semantics<parallel>, #tpu.dimension_semantics<parallel>], iteration_bounds = array<i64: 2, 1>, scalar_prefetch = 0 : i64, scratch_operands = 0 : i64, tpu.core_type = #tpu.core_type<tc>, window_params = [{transform_indices = @transform_0, window_bounds = array<i64: 1, 16, 256>}, {transform_indices = @transform_1, window_bounds = array<i64: 1, 16, 128>}, {pipeline_mode = #tpu.pipeline_mode<synchronous>, transform_indices = @transform_2, window_bounds = array<i64: 80, 64>}, {transform_indices = @transform_3, window_bounds = array<i64: 1, 33, 256>}]} {
    %c0 = arith.constant 0 : index
    %c0_0 = arith.constant 0 : index
    %c0_1 = arith.constant 0 : index
    %0 = vector.load %arg2[%c0, %c0_0, %c0_1] : memref<1x16x256xf32, #tpu.memory_space<vmem>>, vector<1x16x256xf32>
    %1 = vector.shape_cast %0 : vector<1x16x256xf32> to vector<16x256xf32>
    %c0_2 = arith.constant 0 : index
    %c0_3 = arith.constant 0 : index
    %c0_4 = arith.constant 0 : index
    %2 = vector.load %arg3[%c0_2, %c0_3, %c0_4] : memref<1x16x128xf32, #tpu.memory_space<vmem>>, vector<1x16x128xf32>
    %3 = vector.shape_cast %2 : vector<1x16x128xf32> to vector<16x128xf32>
    %4 = tpu.concatenate %1, %3 in 1 : vector<16x256xf32>, vector<16x128xf32> -> vector<16x384xf32>
    %5 = vector.extract_strided_slice %4 {offsets = [0, 0], sizes = [16, 256], strides = [1, 1]} : vector<16x384xf32> to vector<16x256xf32>
    %c383_i32 = arith.constant 383 : i32
    %6 = tpu.dynamic_rotate %4 by %c383_i32 dim 1 : vector<16x384xf32>, i32 -> vector<16x384xf32>
    %7 = vector.extract_strided_slice %6 {offsets = [0, 0], sizes = [16, 256], strides = [1, 1]} : vector<16x384xf32> to vector<16x256xf32>
    %c382_i32 = arith.constant 382 : i32
    %8 = tpu.dynamic_rotate %4 by %c382_i32 dim 1 : vector<16x384xf32>, i32 -> vector<16x384xf32>
    %9 = vector.extract_strided_slice %8 {offsets = [0, 0], sizes = [16, 256], strides = [1, 1]} : vector<16x384xf32> to vector<16x256xf32>
    %c381_i32 = arith.constant 381 : i32
    %10 = tpu.dynamic_rotate %4 by %c381_i32 dim 1 : vector<16x384xf32>, i32 -> vector<16x384xf32>
    %11 = vector.extract_strided_slice %10 {offsets = [0, 0], sizes = [16, 256], strides = [1, 1]} : vector<16x384xf32> to vector<16x256xf32>
    %12 = tpu.concatenate %5, %7, %9, %11 in 0 : vector<16x256xf32>, vector<16x256xf32>, vector<16x256xf32>, vector<16x256xf32> -> vector<64x256xf32>
    %c0_5 = arith.constant 0 : index
    %c0_6 = arith.constant 0 : index
    %13 = vector.load %arg4[%c0_5, %c0_6] : memref<80x64xf32, #tpu.memory_space<vmem>>, vector<80x64xf32>
    %cst = arith.constant dense<0.000000e+00> : vector<80x256xf32>
    %14 = tpu.matmul %13, %12, %cst {dimension_numbers = #tpu.dot_dimension_numbers<[1], [0], [0], [1], [0, 0, 1, 1], [], []>} : vector<80x64xf32>, vector<64x256xf32>, vector<80x256xf32> -> vector<80x256xf32>
    %15 = vector.extract_strided_slice %14 {offsets = [0, 0], sizes = [40, 256], strides = [1, 1]} : vector<80x256xf32> to vector<40x256xf32>
    %16 = vector.extract_strided_slice %14 {offsets = [40, 0], sizes = [40, 256], strides = [1, 1]} : vector<80x256xf32> to vector<40x256xf32>
    %17 = arith.mulf %15, %15 : vector<40x256xf32>
    %18 = arith.mulf %16, %16 : vector<40x256xf32>
    %19 = arith.addf %17, %18 : vector<40x256xf32>
    %cst_7 = arith.constant 9.99999997E-7 : f32
    %20 = vector.broadcast %cst_7 : f32 to vector<40x256xf32>
    %21 = arith.addf %19, %20 : vector<40x256xf32>
    %22 = math.log %21 : vector<40x256xf32>
    %cst_8 = arith.constant 2.500000e-01 : f32
    %23 = vector.broadcast %cst_8 : f32 to vector<40x256xf32>
    %24 = arith.mulf %23, %22 : vector<40x256xf32>
    %cst_9 = arith.constant 1.44858861 : f32
    %25 = vector.broadcast %cst_9 : f32 to vector<40x256xf32>
    %26 = arith.addf %24, %25 : vector<40x256xf32>
    %27 = vector.extract_strided_slice %26 {offsets = [0, 0], sizes = [33, 256], strides = [1, 1]} : vector<40x256xf32> to vector<33x256xf32>
    %c0_10 = arith.constant 0 : index
    %c0_11 = arith.constant 0 : index
    %c0_12 = arith.constant 0 : index
    %28 = vector.load %arg5[%c0_10, %c0_11, %c0_12] : memref<1x33x256xf32, #tpu.memory_space<vmem>>, vector<1x33x256xf32>
    %29 = vector.shape_cast %28 : vector<1x33x256xf32> to vector<33x256xf32>
    %30 = vector.shape_cast %27 : vector<33x256xf32> to vector<1x33x256xf32>
    tpu.vector_store %arg5[%c0_10, %c0_11, %c0_12], %30 {strides = array<i32>} : memref<1x33x256xf32, #tpu.memory_space<vmem>>, vector<1x33x256xf32>,
    return
  }
  func.func @transform_0(%arg0: i32, %arg1: i32) -> (i32, i32, i32) {
    %c0_i32 = arith.constant 0 : i32
    %c0_i32_0 = arith.constant 0 : i32
    return %arg0, %c0_i32, %arg1 : i32, i32, i32
  }
  func.func @transform_1(%arg0: i32, %arg1: i32) -> (i32, i32, i32) {
    %c1_i32 = arith.constant 1 : i32
    %0 = arith.addi %arg1, %c1_i32 : i32
    %c2_i32 = arith.constant 2 : i32
    %1 = arith.muli %0, %c2_i32 : i32
    %c0_i32 = arith.constant 0 : i32
    %c0_i32_0 = arith.constant 0 : i32
    return %arg0, %c0_i32, %1 : i32, i32, i32
  }
  func.func @transform_2(%arg0: i32, %arg1: i32) -> (i32, i32) {
    %c0_i32 = arith.constant 0 : i32
    %c0_i32_0 = arith.constant 0 : i32
    %c0_i32_1 = arith.constant 0 : i32
    return %c0_i32, %c0_i32_0 : i32, i32
  }
  func.func @transform_3(%arg0: i32, %arg1: i32) -> (i32, i32, i32) {
    %c0_i32 = arith.constant 0 : i32
    %c0_i32_0 = arith.constant 0 : i32
    return %arg0, %c0_i32, %arg1 : i32, i32, i32
  }
}

</mosaic_0001>

<bundles_post_ra>
// kernel: tfjs_old_piecewise_spectrogram.1
= control target key start
LH: loop header
LB: loop body
LE: loop exit
PB: predicated region body
PF: predicated region fallthrough
CT: control target
= control target key end

     0   :  { %s1334_s12 = smov 0   ;;  %s1336_s13 = smov 0   ;;  %s1524_s0 = inlined_call_operand.vmem [shape: f32[2,16,384], index: 0, kind: input, shape index: {}, may-alias: {0,1}]   ;;  %s1525_s1 = inlined_call_operand.vmem [shape: f32[2,16,384], index: 1, kind: input, shape index: {}, may-alias: {0,1}]   ;;  %s1526_s2 = inlined_call_operand.vmem [shape: f32[80,64], index: 2, kind: input, shape index: {}]   ;;  %s1527_s3 = inlined_call_operand.vmem [shape: f32[2,33,256], index: 3, kind: output, shape index: {}]  }
   0x1   :  { %s1338_s14 = smov 0   ;;  %s1340_s15 = smov 0  }
   0x2   :  { %s1342_s16 = smov 0  }
   0x3 LB: > { %s25_s17 = sadd.s32 1, %s1289_s15  ;;  %p41_p1 = scmp.ne.s32.totalorder %s1281_s13, %s1277_s12  ;;  %s1293_s16 = sphi %s1342_s16, %s13_s16   ;;  %s1289_s15 = sphi %s1340_s15, %s1532_s15   ;;  %s1285_s14 = sphi %s1338_s14, %s1531_s14   ;;  %s1281_s13 = sphi %s1336_s13, %s1530_s13   ;;  %s1277_s12 = sphi %s1334_s12, %s1529_s12  }
   0x4   : > { %p27_p0 = scmp.ge.s32.totalorder %s25_s17, 2  ;;  %p42_p2 = scmp.eq.s32.totalorder %s1293_s16, 0 }
   0x5   : > { %s34_s20 = sadd.s32 1, %s1281_s13  ;;  %p1038_p5 = scmp.ge.s32.totalorder %s1293_s16, 2 }
   0x6   : > { %s1534_s17 = smov (%p27_p0, %s25_s17), 0  ;;  %p1365_p3 = por %p42_p2, %p41_p1 }
   0x7   : > { %s29_s19 = ssub.s32 %s1289_s15, %s1534_s17  ;;  %151 = sbr.rel (%p1038_p5) target bundleno = 32 (0x20), region = 20 }
   0x8   : > { %p32_p4 = scmp.eq.s32.totalorder %s29_s19, 0 }
   0xa   : > { %s1373_s21 = scalar_select %p32_p4, %s1281_s13, %s34_s20  }
   0xc   : > { %154 = sbr.rel (!%p1365_p3) target bundleno = 25 (0x19), region = 24  ;;  %s156_s22 = sand.u32 (%p1365_p3), 1, %s1281_s13  }
   0xd   : > { %s1097_s23 = smul.u32 (%p1365_p3), 48, %s1289_s15  ;;  %s1039_s24 = sshll.u32 (%p1365_p3), %s156_s22, 5 }
   0xe   : > { %s158_s28 = scalar_lea.vmem (%p1365_p3), [#allocation2], %s1039_s24   ;;  %s1303_s4 = smov (%p1365_p3), 0  }
   0xf   : > { %s168_s27 = scalar_lea.vmem (%p1365_p3), %s1524_s0, %s1097_s23   ;;  %s1295_s29 = smov (%p1365_p3), %s158_s28  }
  0x10   : > { %s1299_s30 = smov (%p1365_p3), %s168_s27   ;;  %s1307_s5 = smov (%p1365_p3), 0  }
  0x11 LB: >> { %v297_v0 = vld [vmem:[%s1301_s30] sm:$0xff]  ;;  %v299_v1 = vld [vmem:[%s1301_s30 + $0x18] sm:$0xff]  ;;  %s301_s6 = sadd.s32 1, %s1305_s4  ;;  %s291_s5 = sadd.s32 1, %s1309_s5   ;;  %s1309_s5 = sphi %s1307_s5, %s291_s5   ;;  %s1305_s4 = sphi %s1303_s4, %s1304_s4   ;;  %s1301_s30 = sphi %s1299_s30, %s306_s30   ;;  %s1297_s29 = sphi %s1295_s29, %s307_s29  }
  0x12   : >> { %298 = vst [vmem:[%s1297_s29] sm:$0xff] %v297_v0  ;;  %p302_p6 = scmp.ge.s32.totalorder %s301_s6, 2  ;;  %p290_p7 = scmp.ge.s32.totalorder %s291_s5, 2 }
  0x13   : >> { %300 = vst [vmem:[%s1297_s29 + $0x10] sm:$0xff] %v299_v1 }
  0x14   : >> { %s1536_s6 = smov (%p302_p6, %s301_s6), 0  ;;  %293 = sbr.rel (!%p290_p7) target bundleno = 17 (0x11), region = 208 }
  0x15   : >> { %s1043_s7 = sshll.u32 %s1536_s6, 3  ;;  %s1304_s4 = smov %s1536_s6  }
  0x16   : >> { %s306_s30 = scalar_lea.vmem %s168_s27, %s1043_s7   ;;  %s307_s29 = scalar_lea.vmem %s158_s28, %s1043_s7 [#allocation2]  }
  0x19 PF: > { %442 = sbr.rel (!%p1365_p3) target bundleno = 32 (0x20), region = 90  ;;  %s444_s8 = sand.u32 (%p1365_p3), 1, %s1281_s13  }
  0x1a   : > { %s1052_s9 = smul.u32 (%p1365_p3), 48, %s1289_s15  ;;  %s1051_s10 = sshll.u32 (%p1365_p3), %s444_s8, 4 }
  0x1b   : > { %s446_s22 = scalar_lea.vmem (%p1365_p3), [#allocation3], %s1051_s10 }
  0x1c   : > { %s906_s20 = scalar_lea.vmem (%p1365_p3), %s1525_s1, %s1052_s9 }
  0x1d   : > { %v1053_v2 = vld [vmem:[%s906_s20 + $0x10] sm:$0xff] (%p1365_p3)  ;;  %v1054_v3 = vld [vmem:[%s906_s20 + $0x28] sm:$0xff] (%p1365_p3) }
  0x1e   : > { %484 = vst [vmem:[%s446_s22] sm:$0xff] %v1053_v2 }
  0x1f   : > { %486 = vst [vmem:[%s446_s22 + $0x8] sm:$0xff] %v1054_v3 }
  0x20 PF: > { %p1055_p8 = scmp.ge.s32.totalorder %s1293_s16, 1  ;;  %p491_p9 = scmp.lt.s32.totalorder %s1293_s16, 3 }
  0x22   : > { %p492_p10 = pnand %p1055_p8, %p491_p9 }
  0x23   : > { %s498_s18 = sand.u32 (!%p492_p10), 1, %s1277_s12   ;;  %s1311_s12 = smov (!%p492_p10), 125  }
  0x24   : > { %495 = sbr.rel (%p492_p10) target bundleno = 370 (0x172), region = 128  ;;  %s1056_s23 = sshll.u32 (!%p492_p10), %s498_s18, 5 }
  0x25   : > { %s1057_s24 = sshll.u32 (!%p492_p10), %s498_s18, 4  ;;  %s500_s25 = scalar_lea.vmem (!%p492_p10), [#allocation2], %s1056_s23 }
  0x26   : > { %s507_s26 = scalar_lea.vmem (!%p492_p10), [#allocation3], %s1057_s24  ;;  %s1312_s27 = smov (!%p492_p10), 126  }
  0x27   : > { %s1313_s28 = smov (!%p492_p10), 127   ;;  %p544_p11 = scmp.lt.s32.totalorder (!%p492_p10), %s1285_s14, 1 }
  0x29   : > { %v1393_v4 = vld [vmem:[%s500_s25 + $0x10] sm:$0xff]  ;;  %v1395_v5 = vld [vmem:[%s500_s25 + $0x18] sm:$0xff]  ;;  %v1397_v6 = vld [vmem:[%s500_s25 + $0x8] sm:$0xff]  ;;  %v571_v13 = vlaneseq  ;;  %vm622_vm3 = vcmask 523264   ;;  %s1538_s14 = smov (!%p544_p11, %s1285_s14), 1 }
  0x2a   : > { %v1174_v7 = vpack.i.bf16 %v1395_v5, %v1393_v4  ;;  %v557_v8 = vld [vmem:[%s507_s26] sm:$0xff]  ;;  %v558_v9 = vld [vmem:[%s507_s26 + $0x8] sm:$0xff] }
  0x2b   : > { %v1401_v10 = vld [vmem:[%s500_s25] sm:$0xff]  ;;  %v1184_v11 = vpack.i.bf16 %v557_v8, %v1397_v6  ;;  %v1405_v15 = vand.u32 127, %v571_v13  ;;  %v617_v54 = vld [vmem:[%s1526_s2 + $0x28] sm:$0xff]  ;;  %v618_v56 = vld [vmem:[%s1526_s2 + $0x30] sm:$0xff] }
  0x2c   : > { %v1194_v12 = vpack.i.bf16 %v1401_v10, %v558_v9  ;;  %1175 = vrot.lane.b32.xlu0 %v1174_v7, %s1311_s12  ;;  %v612_v55 = vld [vmem:[%s1526_s2] sm:$0xff]  ;;  %v613_v57 = vld [vmem:[%s1526_s2 + $0x8] sm:$0xff]  ;;  %v619_v58 = vld [vmem:[%s1526_s2 + $0x38] sm:$0xff] }
  0x2d   : > { %1185 = vrot.lane.b32.xlu1 %v1184_v11, %s1311_s12  ;;  %vm607_vm0 = vcmp.lt.s32.totalorder %v1405_v15, 125  ;;  %vm590_vm1 = vcmp.lt.s32.totalorder %v1405_v15, 126  ;;  %vm573_vm2 = vcmp.lt.s32.totalorder %v1405_v15, 127  ;;  %v614_v59 = vld [vmem:[%s1526_s2 + $0x10] sm:$0xff]  ;;  %v620_v60 = vld [vmem:[%s1526_s2 + $0x40] sm:$0xff]  ;;  %v615_v61 = vld [vmem:[%s1526_s2 + $0x18] sm:$0xff] }
  0x2e   : > { %1195 = vrot.lane.b32.xlu2 %v1194_v12, %s1312_s27  ;;  %v621_v62 = vld [vmem:[%s1526_s2 + $0x48] sm:$0xff]  ;;  %v616_v63 = vld [vmem:[%s1526_s2 + $0x20] sm:$0xff] }
  0x34   : > { %1180 = vrot.lane.b32.xlu0 %v1194_v12, %s1311_s12 }
  0x35   : > { %1190 = vrot.lane.b32.xlu1 %v1174_v7, %s1312_s27 }
  0x36   : > { %1200 = vrot.lane.b32.xlu2 %v1184_v11, %s1312_s27 }
  0x3c   : > { %1205 = vrot.lane.b32.xlu0 %v1174_v7, %s1313_s28 }
  0x3d   : > { %1210 = vrot.lane.b32.xlu1 %v1194_v12, %s1313_s28 }
  0x3e   : > { %1215 = vrot.lane.b32.xlu2 %v1184_v11, %s1313_s28  ;;  %s1098_s28 = smul.u32 80, %s1538_s14 }
  0x40   : > { %s1497_s4 = scalar_lea.vmem %s1527_s3, %s1098_s28 }
  0x88   : > { %v1196_v14 = vpop.permute.xlu2 %1195 }
  0x89   : > { %v1198_v30 = vunpack.i.h.bf16 %v1196_v14  ;;  %v1197_v35 = vunpack.i.l.bf16 %v1196_v14 }
  0x90   : > { %v1201_v21 = vpop.permute.xlu2 %1200 }
  0x91   : > { %v1202_v31 = vunpack.i.l.bf16 %v1201_v21  ;;  %v1203_v36 = vunpack.i.h.bf16 %v1201_v21 }
  0x93   : > { %v593_v39 = vsel %vm590_vm1, %v1198_v30, %v1202_v31  ;;  %v591_v49 = vsel %vm590_vm1, %v1202_v31, %v1203_v36 }
  0x98   : > { %v1216_v38 = vpop.permute.xlu2 %1215 }
  0x99   : > { %v1218_v40 = vunpack.i.h.bf16 %v1216_v38  ;;  %v1217_v44 = vunpack.i.l.bf16 %v1216_v38 }
  0x9b   : > { %v574_v52 = vsel %vm573_vm2, %v1217_v44, %v1218_v40 }
  0x9e   : > { %v1176_v16 = vpop.permute.xlu0 %1175 }
  0x9f   : > { %v1178_v17 = vunpack.i.h.bf16 %v1176_v16  ;;  %v1177_v18 = vunpack.i.l.bf16 %v1176_v16  ;;  %v1186_v19 = vpop.permute.xlu1 %1185 }
  0xa0   : > { %v1187_v23 = vunpack.i.l.bf16 %v1186_v19  ;;  %v1188_v27 = vunpack.i.h.bf16 %v1186_v19 }
  0xa1   : > { %v611_v20 = vsel %vm607_vm0, %v1177_v18, %v1178_v17 }
  0xa2   : > { %661 = vmatpush.msra.mxu0 %v611_v20  ;;  %1081 = vmatpush.msra.mxu2 %v611_v20  ;;  %v608_v37 = vsel %vm607_vm0, %v1187_v23, %v1188_v27 }
  0xa6   : > { %v1181_v22 = vpop.permute.xlu0 %1180 }
  0xa7   : > { %v1191_v24 = vpop.permute.xlu1 %1190  ;;  %v1183_v25 = vunpack.i.h.bf16 %v1181_v22  ;;  %v1182_v26 = vunpack.i.l.bf16 %v1181_v22 }
  0xa8   : > { %v1193_v28 = vunpack.i.h.bf16 %v1191_v24  ;;  %v1192_v29 = vunpack.i.l.bf16 %v1191_v24 }
  0xa9   : > { %v610_v32 = vsel %vm607_vm0, %v1183_v25, %v1187_v23  ;;  %v609_v33 = vsel %vm607_vm0, %v1178_v17, %v1182_v26 }
  0xaa   : > { %662 = vmatpush.msra.mxu0 %v610_v32  ;;  %1082 = vmatpush.msra.mxu2 %v610_v32  ;;  %v594_v34 = vsel %vm590_vm1, %v1192_v29, %v1193_v28  ;;  %v592_v42 = vsel %vm590_vm1, %v1193_v28, %v1197_v35 }
  0xab   : > { %708 = vmatpush.msra.mxu1 %v609_v33  ;;  %1089 = vmatpush.msra.mxu3 %v609_v33 }
  0xac   : > { %663 = vmatpush.msra.mxu0 %v594_v34  ;;  %1083 = vmatpush.msra.mxu2 %v594_v34 }
  0xad   : > { %709 = vmatpush.msra.mxu1 %v608_v37  ;;  %1090 = vmatpush.msra.mxu3 %v608_v37 }
  0xae   : > { %v1206_v41 = vpop.permute.xlu0 %1205  ;;  %664 = vmatpush.msra.mxu0 %v593_v39  ;;  %1084 = vmatpush.msra.mxu2 %v593_v39 }
  0xaf   : > { %v1211_v43 = vpop.permute.xlu1 %1210  ;;  %v1208_v45 = vunpack.i.h.bf16 %v1206_v41  ;;  %v1207_v46 = vunpack.i.l.bf16 %v1206_v41  ;;  %710 = vmatpush.msra.mxu1 %v592_v42  ;;  %1091 = vmatpush.msra.mxu3 %v592_v42 }
  0xb0   : > { %v1213_v47 = vunpack.i.h.bf16 %v1211_v43  ;;  %v1212_v48 = vunpack.i.l.bf16 %v1211_v43 }
  0xb1   : > { %711 = vmatpush.msra.mxu1 %v591_v49  ;;  %1092 = vmatpush.msra.mxu3 %v591_v49  ;;  %v577_v50 = vsel %vm573_vm2, %v1207_v46, %v1208_v45 }
  0xb2   : > { %665 = vmatpush.msra.mxu0 %v577_v50  ;;  %1085 = vmatpush.msra.mxu2 %v577_v50  ;;  %v575_v51 = vsel %vm573_vm2, %v1208_v45, %v1212_v48  ;;  %v576_v53 = vsel %vm573_vm2, %v1213_v47, %v1217_v44 }
  0xb3   : > { %712 = vmatpush.msra.mxu1 %v575_v51  ;;  %1093 = vmatpush.msra.mxu3 %v575_v51 }
  0xb4   : > { %666 = vmatpush.msra.mxu0 %v576_v53  ;;  %1086 = vmatpush.msra.mxu2 %v576_v53 }
  0xb5   : > { %713 = vmatpush.msra.mxu1 %v574_v52  ;;  %1094 = vmatpush.msra.mxu3 %v574_v52 }
  0xb6   : > { %1087 = vmatpush.msra.mxu2 %v1393_v4  ;;  %667 = vmatpush.msra.mxu0 %v1393_v4 }
  0xb7   : > { %1095 = vmatpush.msra.mxu3 %v1395_v5  ;;  %714 = vmatpush.msra.mxu1 %v1395_v5 }
  0xb8   : > { %1088 = vmatpush.msra.mxu2 %v1401_v10  ;;  %668 = vmatpush.msra.mxu0 %v1401_v10 }
  0xb9   : > { %1096 = vmatpush.msra.mxu3 %v1397_v6  ;;  %1064 = vmatmul.msk.f32.vlgmr.msra.gmra.mxu2 %vm622_vm3, %v617_v54 }
  0xba   : > { %1074 = vmatmul.msk.f32.vlgmr.msra.gmra.mxu3 %vm622_vm3, %v617_v54  ;;  %715 = vmatpush.msra.mxu1 %v1397_v6 }
  0xbb   : > { %1059 = vmatmul.msk.f32.vlgmr.msra.gmra.mxu0 %vm622_vm3, %v612_v55  ;;  %1069 = vmatmul.msk.f32.vlgmr.msra.gmra.mxu1 %vm622_vm3, %v612_v55 }
  0xc1   : > { %1065 = vmatmul.msk.f32.gmra.mxu2 %vm622_vm3, %v618_v56 }
  0xc2   : > { %1075 = vmatmul.msk.f32.gmra.mxu3 %vm622_vm3, %v618_v56 }
  0xc3   : > { %1060 = vmatmul.msk.f32.gmra.mxu0 %vm622_vm3, %v613_v57  ;;  %1070 = vmatmul.msk.f32.gmra.mxu1 %vm622_vm3, %v613_v57 }
  0xc9   : > { %1066 = vmatmul.msk.f32.gmra.mxu2 %vm622_vm3, %v619_v58 }
  0xca   : > { %1076 = vmatmul.msk.f32.gmra.mxu3 %vm622_vm3, %v619_v58 }
  0xcb   : > { %1061 = vmatmul.msk.f32.gmra.mxu0 %vm622_vm3, %v614_v59  ;;  %1071 = vmatmul.msk.f32.gmra.mxu1 %vm622_vm3, %v614_v59 }
  0xd1   : > { %1067 = vmatmul.msk.f32.gmra.mxu2 %vm622_vm3, %v620_v60 }
  0xd2   : > { %1077 = vmatmul.msk.f32.gmra.mxu3 %vm622_vm3, %v620_v60 }
  0xd3   : > { %1062 = vmatmul.msk.f32.gmra.mxu0 %vm622_vm3, %v615_v61  ;;  %1072 = vmatmul.msk.f32.gmra.mxu1 %vm622_vm3, %v615_v61 }
  0xd9   : > { %1068 = vmatmul.msk.f32.gmra.mxu2 %vm622_vm3, %v621_v62 }
  0xda   : > { %1078 = vmatmul.msk.f32.gmra.mxu3 %vm622_vm3, %v621_v62 }
  0xdb   : > { %1063 = vmatmul.msk.f32.gmra.mxu0 %vm622_vm3, %v616_v63  ;;  %1073 = vmatmul.msk.f32.gmra.mxu1 %vm622_vm3, %v616_v63 }
 0x138   : > { %v670_v0 = vpop.f32.mrf.mxu0  ;;  %v717_v1 = vpop.f32.mrf.mxu1 }
 0x139   : > { %v747_v2 = vmul.f32 %v670_v0, %v670_v0  ;;  %v748_v4 = vmul.f32 %v717_v1, %v717_v1 }
 0x13c   : > { %v685_v3 = vpop.f32.mrf.mxu2 }
 0x13d   : > { %v757_v5 = vmul.f32 %v685_v3, %v685_v3  ;;  %v732_v6 = vpop.f32.mrf.mxu3 }
 0x13e   : > { %v758_v7 = vmul.f32 %v732_v6, %v732_v6 }
 0x13f   : > { %v767_v8 = vadd.f32 %v757_v5, %v747_v2 }
 0x140   : > { %v768_v9 = vadd.f32 %v758_v7, %v748_v4  ;;  %v673_v10 = vpop.f32.mrf.mxu0  ;;  %v720_v11 = vpop.f32.mrf.mxu1 }
 0x141   : > { %v777_v12 = vadd.f32 1e-06, %v767_v8  ;;  %v749_v14 = vmul.f32 %v673_v10, %v673_v10  ;;  %v750_v16 = vmul.f32 %v720_v11, %v720_v11 }
 0x142   : > { %v778_v13 = vadd.f32 1e-06, %v768_v9 }
 0x143   : > { %1219 = vlog2.f32 %v777_v12 }
 0x144   : > { %1221 = vlog2.f32 %v778_v13  ;;  %v688_v15 = vpop.f32.mrf.mxu2 }
 0x145   : > { %v759_v17 = vmul.f32 %v688_v15, %v688_v15  ;;  %v735_v18 = vpop.f32.mrf.mxu3 }
 0x146   : > { %v760_v19 = vmul.f32 %v735_v18, %v735_v18 }
 0x147   : > { %v769_v20 = vadd.f32 %v759_v17, %v749_v14 }
 0x148   : > { %v770_v21 = vadd.f32 %v760_v19, %v750_v16  ;;  %v676_v22 = vpop.f32.mrf.mxu0  ;;  %v723_v23 = vpop.f32.mrf.mxu1 }
 0x149   : > { %v1220_v24 = vpop.eup %1219  ;;  %v779_v25 = vadd.f32 1e-06, %v769_v20  ;;  %v751_v30 = vmul.f32 %v676_v22, %v676_v22  ;;  %v752_v33 = vmul.f32 %v723_v23, %v723_v23 }
 0x14a   : > { %v1222_v26 = vpop.eup %1221  ;;  %v788_v27 = vmul.f32 0.6931472, %v1220_v24  ;;  %v780_v28 = vadd.f32 1e-06, %v770_v21 }
 0x14b   : > { %v790_v29 = vmul.f32 0.6931472, %v1222_v26  ;;  %1223 = vlog2.f32 %v779_v25 }
 0x14c   : > { %v807_v31 = vmul.f32 0.25, %v788_v27  ;;  %1225 = vlog2.f32 %v780_v28  ;;  %v691_v32 = vpop.f32.mrf.mxu2 }
 0x14d   : > { %v808_v34 = vmul.f32 0.25, %v790_v29  ;;  %v761_v35 = vmul.f32 %v691_v32, %v691_v32  ;;  %v738_v36 = vpop.f32.mrf.mxu3 }
 0x14e   : > { %v817_v37 = vadd.f32 1.4485886, %v807_v31  ;;  %v762_v38 = vmul.f32 %v738_v36, %v738_v36 }
 0x14f   : > { %v818_v39 = vadd.f32 1.4485886, %v808_v34  ;;  %v771_v40 = vadd.f32 %v761_v35, %v751_v30 }
 0x150   : > { %827 = vst [vmem:[%s1497_s4] sm:$0xff] %v817_v37  ;;  %v772_v41 = vadd.f32 %v762_v38, %v752_v33  ;;  %v679_v42 = vpop.f32.mrf.mxu0  ;;  %v726_v43 = vpop.f32.mrf.mxu1 }
 0x151   : > { %v1224_v44 = vpop.eup %1223  ;;  %828 = vst [vmem:[%s1497_s4 + $0x8] sm:$0xff] %v818_v39  ;;  %v781_v45 = vadd.f32 1e-06, %v771_v40  ;;  %v753_v50 = vmul.f32 %v679_v42, %v679_v42  ;;  %v754_v53 = vmul.f32 %v726_v43, %v726_v43 }
 0x152   : > { %v1226_v46 = vpop.eup %1225  ;;  %v792_v47 = vmul.f32 0.6931472, %v1224_v44  ;;  %v782_v48 = vadd.f32 1e-06, %v772_v41 }
 0x153   : > { %v794_v49 = vmul.f32 0.6931472, %v1226_v46  ;;  %1227 = vlog2.f32 %v781_v45 }
 0x154   : > { %v809_v51 = vmul.f32 0.25, %v792_v47  ;;  %1229 = vlog2.f32 %v782_v48  ;;  %v694_v52 = vpop.f32.mrf.mxu2 }
 0x155   : > { %v810_v54 = vmul.f32 0.25, %v794_v49  ;;  %v763_v55 = vmul.f32 %v694_v52, %v694_v52  ;;  %v741_v56 = vpop.f32.mrf.mxu3 }
 0x156   : > { %v819_v57 = vadd.f32 1.4485886, %v809_v51  ;;  %v764_v58 = vmul.f32 %v741_v56, %v741_v56 }
 0x157   : > { %v820_v59 = vadd.f32 1.4485886, %v810_v54  ;;  %v773_v60 = vadd.f32 %v763_v55, %v753_v50 }
 0x158   : > { %829 = vst [vmem:[%s1497_s4 + $0x10] sm:$0xff] %v819_v57  ;;  %v774_v61 = vadd.f32 %v764_v58, %v754_v53  ;;  %v682_v62 = vpop.f32.mrf.mxu0  ;;  %v729_v1 = vpop.f32.mrf.mxu1 }
 0x159   : > { %v1228_v63 = vpop.eup %1227  ;;  %830 = vst [vmem:[%s1497_s4 + $0x18] sm:$0xff] %v820_v59  ;;  %v783_v0 = vadd.f32 1e-06, %v773_v60  ;;  %v755_v6 = vmul.f32 %v682_v62, %v682_v62  ;;  %v756_v9 = vmul.f32 %v729_v1, %v729_v1 }
 0x15a   : > { %v1230_v2 = vpop.eup %1229  ;;  %v796_v3 = vmul.f32 0.6931472, %v1228_v63  ;;  %v784_v4 = vadd.f32 1e-06, %v774_v61 }
 0x15b   : > { %v798_v5 = vmul.f32 0.6931472, %v1230_v2  ;;  %1231 = vlog2.f32 %v783_v0 }
 0x15c   : > { %v811_v7 = vmul.f32 0.25, %v796_v3  ;;  %1233 = vlog2.f32 %v784_v4  ;;  %v697_v8 = vpop.f32.mrf.mxu2 }
 0x15d   : > { %v812_v10 = vmul.f32 0.25, %v798_v5  ;;  %v765_v11 = vmul.f32 %v697_v8, %v697_v8  ;;  %v744_v12 = vpop.f32.mrf.mxu3 }
 0x15e   : > { %v821_v13 = vadd.f32 1.4485886, %v811_v7  ;;  %v766_v14 = vmul.f32 %v744_v12, %v744_v12 }
 0x15f   : > { %v822_v15 = vadd.f32 1.4485886, %v812_v10  ;;  %v775_v16 = vadd.f32 %v765_v11, %v755_v6 }
 0x160   : > { %831 = vst [vmem:[%s1497_s4 + $0x20] sm:$0xff] %v821_v13  ;;  %v776_v17 = vadd.f32 %v766_v14, %v756_v9 }
 0x161   : > { %v1232_v18 = vpop.eup %1231  ;;  %832 = vst [vmem:[%s1497_s4 + $0x28] sm:$0xff] %v822_v15  ;;  %v785_v19 = vadd.f32 1e-06, %v775_v16 }
 0x162   : > { %v1234_v20 = vpop.eup %1233  ;;  %v800_v21 = vmul.f32 0.6931472, %v1232_v18  ;;  %v786_v22 = vadd.f32 1e-06, %v776_v17 }
 0x163   : > { %v802_v23 = vmul.f32 0.6931472, %v1234_v20  ;;  %1235 = vlog2.f32 %v785_v19 }
 0x164   : > { %v813_v24 = vmul.f32 0.25, %v800_v21  ;;  %1237 = vlog2.f32 %v786_v22 }
 0x165   : > { %v814_v25 = vmul.f32 0.25, %v802_v23 }
 0x166   : > { %v823_v26 = vadd.f32 1.4485886, %v813_v24 }
 0x167   : > { %v824_v27 = vadd.f32 1.4485886, %v814_v25 }
 0x168   : > { %833 = vst [vmem:[%s1497_s4 + $0x30] sm:$0xff] %v823_v26 }
 0x169   : > { %v1236_v28 = vpop.eup %1235  ;;  %834 = vst [vmem:[%s1497_s4 + $0x38] sm:$0xff] %v824_v27 }
 0x16a   : > { %v1238_v29 = vpop.eup %1237  ;;  %v804_v30 = vmul.f32 0.6931472, %v1236_v28 }
 0x16b   : > { %v806_v31 = vmul.f32 0.6931472, %v1238_v29 }
 0x16c   : > { %v815_v32 = vmul.f32 0.25, %v804_v30 }
 0x16d   : > { %v816_v33 = vmul.f32 0.25, %v806_v31 }
 0x16e   : > { %v825_v34 = vadd.f32 1.4485886, %v815_v32 }
 0x16f   : > { %v826_v35 = vadd.f32 1.4485886, %v816_v33 }
 0x170   : > { %835 = vst [vmem:[%s1497_s4 + $0x40] sm:$0x1] %v825_v34 }
 0x171   : > { %836 = vst [vmem:[%s1497_s4 + $0x48] sm:$0x1] %v826_v35 }
 0x172 PF: > { %s13_s16 = sadd.s32 1, %s1293_s16   ;;  %s1529_s12 = smov %s1281_s13 }
 0x173   : > { %p10_p12 = scmp.ge.s32.totalorder %s13_s16, 4   ;;  %s1530_s13 = smov %s1373_s21 }
 0x174   : > { %s1531_s14 = smov %s1289_s15  ;;  %s1532_s15 = smov %s1534_s17 }
 0x175   :  { %12 = sbr.rel (!%p10_p12) target bundleno = 3 (0x3), region = 241 }

</bundles_post_ra>
